<compile_context>
chip_gen: v7x
topology: tpu7x:2x2x1
jax: 0.10.0
libtpu: 0.0.40
codegen_flags: <defaults>
</compile_context>

<pallas_src>
import functools

import jax
import jax.numpy as jnp
from jax.experimental import pallas as pl
from jax.experimental.pallas import tpu as pltpu


def _critic_kernel(x_ref, w1_ref, b1_ref, w2_ref, b2_ref, w3_ref, b3_ref, o_ref,
                   *, use_tanh: bool):
    """One batch tile of the fused Critic forward pass.

    x_ref : (TB, state_dim)  f32   (pipelined per grid step)
    w1_ref: (state_dim, H1)  bf16  (resident)     b1_ref: (1, H1) f32
    w2_ref: (H1, H2)         bf16  (resident)     b2_ref: (1, H2) f32
    w3_ref: (1, H2)          f32   (fc3 weight as a row, resident)
    b3_ref: (1, 1)           f32   (SMEM scalar)
    o_ref : (TB, 1)          f32
    """
    # fc1: bf16 operands on the MXU, f32 accumulate.
    x = x_ref[...].astype(jnp.bfloat16)
    h1 = jnp.dot(x, w1_ref[...], preferred_element_type=jnp.float32) + b1_ref[...]
    # Hidden activation in bf16 (next matmul consumes bf16; bf16 EUP on v6e/v7x).
    if use_tanh:
        h1 = jnp.tanh(h1.astype(jnp.bfloat16))
    else:
        h1 = jnp.maximum(h1, 0.0).astype(jnp.bfloat16)

    # fc2
    h2 = jnp.dot(h1, w2_ref[...], preferred_element_type=jnp.float32) + b2_ref[...]
    # Keep the last activation in f32: it feeds the f32 VPU fc3 head.
    h2 = jnp.tanh(h2) if use_tanh else jnp.maximum(h2, 0.0)

    # fc3: N=1 head -> VPU multiply + cross-lane reduce (keeps the MXU free).
    v = jnp.sum(h2 * w3_ref[...], axis=-1, keepdims=True) + b3_ref[0, 0]   # (TB, 1)
    o_ref[...] = v.astype(o_ref.dtype)


def _pick_batch_tile(B: int, block_batch: int) -> int:
    """Batch tile: big enough to amortize the ~0.35us per-grid-step overhead,
    small enough to keep >=2 grid steps (v7x two-TC sharding) and bounded VMEM
    (cap 4096 rows).  Multiple of 8 (sublane) unless it covers the whole batch."""
    if B <= 256:
        return B                                      # single full-array block
    target = ((pl.cdiv(B, 4) + 127) // 128) * 128     # aim for ~4 grid steps
    return max(256, min(block_batch, target))


def critic_forward(state, kernel_params, *, use_tanh: bool, block_batch: int = 4096):
    """state: (B, state_dim) f32. Returns (B, 1) f32."""
    w1, b1, w2, b2, w3_row, b3 = kernel_params
    B, S = state.shape
    H1 = w1.shape[1]
    H2 = w2.shape[1]

    tb = _pick_batch_tile(B, block_batch)
    num_tiles = pl.cdiv(B, tb)          # last block may be partial (no jnp.pad)

    kernel = functools.partial(_critic_kernel, use_tanh=use_tanh)
    const2 = lambda i: (0, 0)   # weights/biases: same block every step -> resident

    # TODO(synk): on v7x, verify "parallel" actually shards the batch grid axis
    # across the two TensorCores; otherwise switch to CORE_PARALLEL / core_map.
    out = pl.pallas_call(
        kernel,
        out_shape=jax.ShapeDtypeStruct((B, 1), jnp.float32),
        grid=(num_tiles,),
        in_specs=[
            pl.BlockSpec((tb, S), lambda i: (i, 0)),       # state tile (pipelined)
            pl.BlockSpec((S, H1), const2),                 # w1 (bf16)
            pl.BlockSpec((1, H1), const2),                 # b1
            pl.BlockSpec((H1, H2), const2),                # w2 (bf16)
            pl.BlockSpec((1, H2), const2),                 # b2
            pl.BlockSpec((1, H2), const2),                 # w3 as a row (f32)
            pl.BlockSpec(memory_space=pltpu.MemorySpace.SMEM),  # b3 scalar
        ],
        out_specs=pl.BlockSpec((tb, 1), lambda i: (i, 0)),
        compiler_params=pltpu.CompilerParams(
            dimension_semantics=("parallel",)),
    )(state, w1, b1, w2, b2, w3_row, b3)

    return out


def init_critic_params(key, state_dim, hidden_1=128, hidden_2=128):
    """nn.Linear-style init U(-1/sqrt(fan_in), 1/sqrt(fan_in)).
    Weights returned already transposed to (in, out); biases as (1, out)."""
    ks = jax.random.split(key, 6)

    def lin(kw, kb, fan_in, fan_out):
        bound = 1.0 / jnp.sqrt(jnp.float32(fan_in))
        w = jax.random.uniform(kw, (fan_in, fan_out), jnp.float32, -bound, bound)
        b = jax.random.uniform(kb, (1, fan_out), jnp.float32, -bound, bound)
        return w, b

    w1, b1 = lin(ks[0], ks[1], state_dim, hidden_1)
    w2, b2 = lin(ks[2], ks[3], hidden_1, hidden_2)
    w3, b3 = lin(ks[4], ks[5], hidden_2, 1)
    return (w1, b1, w2, b2, w3, b3)


def prepare_kernel_params(params_f32):
    """Pack f32 reference params into the kernel layout:
    w1/w2 -> bf16 (MXU operands), w3 -> (1, H2) f32 row, b3 -> (1, 1) f32 scalar."""
    w1, b1, w2, b2, w3, b3 = params_f32
    return (w1.astype(jnp.bfloat16), b1,
            w2.astype(jnp.bfloat16), b2,
            w3.reshape(1, -1).astype(jnp.float32),
            b3.reshape(1, 1).astype(jnp.float32))


def critic_reference(state, params_f32, *, use_tanh: bool, mode: str = "f32"):
    """Pure-JAX reference.
    mode="kernel": mirrors the kernel's bf16-operand / f32-accumulate recipe
                   (bf16 hidden activations).
    mode="f32"   : pure f32 (PyTorch module semantics)."""
    w1, b1, w2, b2, w3, b3 = params_f32
    act = jnp.tanh if use_tanh else (lambda v: jnp.maximum(v, 0.0))
    if mode == "f32":
        h1 = act(jnp.dot(state, w1, preferred_element_type=jnp.float32) + b1)
        h2 = act(jnp.dot(h1, w2, preferred_element_type=jnp.float32) + b2)
        return jnp.dot(h2, w3, preferred_element_type=jnp.float32) + b3

    bf16 = jnp.bfloat16
    h1 = jnp.dot(state.astype(bf16), w1.astype(bf16),
                 preferred_element_type=jnp.float32) + b1
    if use_tanh:
        h1 = jnp.tanh(h1.astype(bf16))
    else:
        h1 = jnp.maximum(h1, 0.0).astype(bf16)
    h2 = jnp.dot(h1, w2.astype(bf16), preferred_element_type=jnp.float32) + b2
    h2 = act(h2)
    return jnp.sum(h2 * w3.reshape(1, -1), axis=-1, keepdims=True) + b3.reshape(1, 1)


if __name__ == "__main__":
    key = jax.random.PRNGKey(0)
    k_params, k_state, k_state2 = jax.random.split(key, 3)

    STATE_DIM, H1, H2 = 32, 128, 128
    B = 256   # small demo batch -> two 128-row grid steps... (tile chooser -> 1 block)

    params_f32 = init_critic_params(k_params, STATE_DIM, H1, H2)
    kparams = prepare_kernel_params(params_f32)
    state = jax.random.normal(k_state, (B, STATE_DIM), jnp.float32)

    for use_tanh in (True, False):   # tanh path and ReLU path
        value = jax.block_until_ready(
            critic_forward(state, kparams, use_tanh=use_tanh))
        assert value.shape == (B, 1), value.shape

        ref_k = critic_reference(state, params_f32, use_tanh=use_tanh, mode="kernel")
        err_k = jnp.max(jnp.abs(value - ref_k))
        assert jnp.allclose(value, ref_k, atol=2e-2, rtol=2e-2), (
            f"use_tanh={use_tanh}: max err vs bf16-mirror ref {err_k}")

        ref_f = critic_reference(state, params_f32, use_tanh=use_tanh, mode="f32")
        err_f = jnp.max(jnp.abs(value - ref_f))
        assert jnp.allclose(value, ref_f, atol=1e-1, rtol=1e-1), (
            f"use_tanh={use_tanh}: max err vs f32 ref {err_f}")

    # Ragged batch: exercises the partial-last-block path (no full-array pad).
    B_r = 300
    state_r = jax.random.normal(k_state2, (B_r, STATE_DIM), jnp.float32)
    v_r = jax.block_until_ready(critic_forward(state_r, kparams, use_tanh=True))
    assert v_r.shape == (B_r, 1), v_r.shape
    ref_r = critic_reference(state_r, params_f32, use_tanh=True, mode="kernel")
    assert jnp.allclose(v_r, ref_r, atol=2e-2, rtol=2e-2), (
        f"ragged batch max err {jnp.max(jnp.abs(v_r - ref_r))}")

    print("KERNEL_OK")
</pallas_src>

<mosaic_0001>
module attributes {stable_mosaic.version = 11 : i64} {
  func.func @_critic_kernel(%arg0: i32, %arg1: memref<256x32xf32, #tpu.memory_space<vmem>>, %arg2: memref<32x128xbf16, #tpu.memory_space<vmem>>, %arg3: memref<1x128xf32, #tpu.memory_space<vmem>>, %arg4: memref<128x128xbf16, #tpu.memory_space<vmem>>, %arg5: memref<1x128xf32, #tpu.memory_space<vmem>>, %arg6: memref<1x128xf32, #tpu.memory_space<vmem>>, %arg7: memref<1x1xf32, #tpu.memory_space<smem>>, %arg8: memref<256x1xf32, #tpu.memory_space<vmem>>) attributes {dimension_semantics = [#tpu.dimension_semantics<parallel>], iteration_bounds = array<i64: 1>, scalar_prefetch = 0 : i64, scratch_operands = 0 : i64, tpu.core_type = #tpu.core_type<tc>, window_params = [{transform_indices = @transform_0, window_bounds = array<i64: 256, 32>}, {pipeline_mode = #tpu.pipeline_mode<synchronous>, transform_indices = @transform_1, window_bounds = array<i64: 32, 128>}, {pipeline_mode = #tpu.pipeline_mode<synchronous>, transform_indices = @transform_2, window_bounds = array<i64: 1, 128>}, {pipeline_mode = #tpu.pipeline_mode<synchronous>, transform_indices = @transform_3, window_bounds = array<i64: 128, 128>}, {pipeline_mode = #tpu.pipeline_mode<synchronous>, transform_indices = @transform_4, window_bounds = array<i64: 1, 128>}, {pipeline_mode = #tpu.pipeline_mode<synchronous>, transform_indices = @transform_5, window_bounds = array<i64: 1, 128>}, {transform_indices = @transform_6, window_bounds = array<i64: 1, 1>}, {transform_indices = @transform_7, window_bounds = array<i64: 256, 1>}]} {
    %c0 = arith.constant 0 : index
    %c0_0 = arith.constant 0 : index
    %0 = vector.load %arg1[%c0, %c0_0] : memref<256x32xf32, #tpu.memory_space<vmem>>, vector<256x32xf32>
    %1 = arith.truncf %0 : vector<256x32xf32> to vector<256x32xbf16>
    %c0_1 = arith.constant 0 : index
    %c0_2 = arith.constant 0 : index
    %2 = vector.load %arg2[%c0_1, %c0_2] : memref<32x128xbf16, #tpu.memory_space<vmem>>, vector<32x128xbf16>
    %cst = arith.constant dense<0.000000e+00> : vector<256x128xf32>
    %3 = tpu.matmul %1, %2, %cst {dimension_numbers = #tpu.dot_dimension_numbers<[1], [0], [0], [1], [0, 0, 1, 1], [], []>} : vector<256x32xbf16>, vector<32x128xbf16>, vector<256x128xf32> -> vector<256x128xf32>
    %c0_3 = arith.constant 0 : index
    %c0_4 = arith.constant 0 : index
    %4 = vector.load %arg3[%c0_3, %c0_4] : memref<1x128xf32, #tpu.memory_space<vmem>>, vector<1x128xf32>
    %5 = vector.broadcast %4 : vector<1x128xf32> to vector<256x128xf32>
    %6 = arith.addf %3, %5 : vector<256x128xf32>
    %7 = arith.truncf %6 : vector<256x128xf32> to vector<256x128xbf16>
    %8 = math.tanh %7 : vector<256x128xbf16>
    %c0_5 = arith.constant 0 : index
    %c0_6 = arith.constant 0 : index
    %9 = vector.load %arg4[%c0_5, %c0_6] : memref<128x128xbf16, #tpu.memory_space<vmem>>, vector<128x128xbf16>
    %cst_7 = arith.constant dense<0.000000e+00> : vector<256x128xf32>
    %10 = tpu.matmul %8, %9, %cst_7 {dimension_numbers = #tpu.dot_dimension_numbers<[1], [0], [0], [1], [0, 0, 1, 1], [], []>} : vector<256x128xbf16>, vector<128x128xbf16>, vector<256x128xf32> -> vector<256x128xf32>
    %c0_8 = arith.constant 0 : index
    %c0_9 = arith.constant 0 : index
    %11 = vector.load %arg5[%c0_8, %c0_9] : memref<1x128xf32, #tpu.memory_space<vmem>>, vector<1x128xf32>
    %12 = vector.broadcast %11 : vector<1x128xf32> to vector<256x128xf32>
    %13 = arith.addf %10, %12 : vector<256x128xf32>
    %14 = math.tanh %13 : vector<256x128xf32>
    %c0_10 = arith.constant 0 : index
    %c0_11 = arith.constant 0 : index
    %15 = vector.load %arg6[%c0_10, %c0_11] : memref<1x128xf32, #tpu.memory_space<vmem>>, vector<1x128xf32>
    %16 = vector.broadcast %15 : vector<1x128xf32> to vector<256x128xf32>
    %17 = arith.mulf %14, %16 : vector<256x128xf32>
    %cst_12 = arith.constant dense<0.000000e+00> : vector<256xf32>
    %18 = vector.multi_reduction <add>, %17, %cst_12 [1] : vector<256x128xf32> to vector<256xf32>
    %19 = vector.shape_cast %18 : vector<256xf32> to vector<256x1xf32>
    %c0_13 = arith.constant 0 : index
    %c0_14 = arith.constant 0 : index
    %20 = memref.load %arg7[%c0_13, %c0_14] : memref<1x1xf32, #tpu.memory_space<smem>>
    %21 = vector.broadcast %20 : f32 to vector<256x1xf32>
    %22 = arith.addf %19, %21 : vector<256x1xf32>
    %c0_15 = arith.constant 0 : index
    %c0_16 = arith.constant 0 : index
    %23 = vector.load %arg8[%c0_15, %c0_16] : memref<256x1xf32, #tpu.memory_space<vmem>>, vector<256x1xf32>
    tpu.vector_store %arg8[%c0_15, %c0_16], %22 {strides = array<i32>} : memref<256x1xf32, #tpu.memory_space<vmem>>, vector<256x1xf32>,
    return
  }
  func.func @transform_0(%arg0: i32) -> (i32, i32) {
    %c0_i32 = arith.constant 0 : i32
    %c0_i32_0 = arith.constant 0 : i32
    return %arg0, %c0_i32 : i32, i32
  }
  func.func @transform_1(%arg0: i32) -> (i32, i32) {
    %c0_i32 = arith.constant 0 : i32
    %c0_i32_0 = arith.constant 0 : i32
    %c0_i32_1 = arith.constant 0 : i32
    return %c0_i32, %c0_i32_0 : i32, i32
  }
  func.func @transform_2(%arg0: i32) -> (i32, i32) {
    %c0_i32 = arith.constant 0 : i32
    %c0_i32_0 = arith.constant 0 : i32
    %c0_i32_1 = arith.constant 0 : i32
    return %c0_i32, %c0_i32_0 : i32, i32
  }
  func.func @transform_3(%arg0: i32) -> (i32, i32) {
    %c0_i32 = arith.constant 0 : i32
    %c0_i32_0 = arith.constant 0 : i32
    %c0_i32_1 = arith.constant 0 : i32
    return %c0_i32, %c0_i32_0 : i32, i32
  }
  func.func @transform_4(%arg0: i32) -> (i32, i32) {
    %c0_i32 = arith.constant 0 : i32
    %c0_i32_0 = arith.constant 0 : i32
    %c0_i32_1 = arith.constant 0 : i32
    return %c0_i32, %c0_i32_0 : i32, i32
  }
  func.func @transform_5(%arg0: i32) -> (i32, i32) {
    %c0_i32 = arith.constant 0 : i32
    %c0_i32_0 = arith.constant 0 : i32
    %c0_i32_1 = arith.constant 0 : i32
    return %c0_i32, %c0_i32_0 : i32, i32
  }
  func.func @transform_6(%arg0: i32) -> (i32, i32) {
    %c0_i32 = arith.constant 0 : i32
    %c0_i32_0 = arith.constant 0 : i32
    %c0_i32_1 = arith.constant 0 : i32
    return %c0_i32, %c0_i32_0 : i32, i32
  }
  func.func @transform_7(%arg0: i32) -> (i32, i32) {
    %c0_i32 = arith.constant 0 : i32
    %c0_i32_0 = arith.constant 0 : i32
    return %arg0, %c0_i32 : i32, i32
  }
}

</mosaic_0001>

<bundles_post_ra>
// kernel: tpu_custom_call.1
= control target key start
LH: loop header
LB: loop body
LE: loop exit
PB: predicated region body
PF: predicated region fallthrough
CT: control target
= control target key end

     0   :  { %vm99_vm0 = vcmask 261120   ;;  %vm742_vm1 = vcmask 7168   ;;  %s1514_s1 = inlined_call_operand.vmem [shape: bf16[32,128], index: 1, kind: input, shape index: {}]   ;;  %s1515_s0 = inlined_call_operand.vmem [shape: f32[256,32], index: 0, kind: input, shape index: {}]   ;;  %s1516_s3 = inlined_call_operand.vmem [shape: bf16[128,128], index: 3, kind: input, shape index: {}]   ;;  %s1517_s2 = inlined_call_operand.vmem [shape: f32[1,128], index: 2, kind: input, shape index: {}]   ;;  %s1518_s4 = inlined_call_operand.vmem [shape: f32[1,128], index: 4, kind: input, shape index: {}]   ;;  %s1519_s5 = inlined_call_operand.vmem [shape: f32[1,128], index: 5, kind: input, shape index: {}]   ;;  %s1520_s6 = inlined_call_operand.<no memory space> [shape: f32[1,1], index: 6, kind: input, shape index: {}]   ;;  %s1521_s7 = inlined_call_operand.vmem [shape: f32[256,1], index: 7, kind: output, shape index: {}]  }
   0x1   :  { %v950_v0 = vld [vmem:[%s1514_s1] sm:$0xff]   ;;  %v951_v1 = vld [vmem:[%s1514_s1 + $0x8] sm:$0xff]   ;;  %v30_v5 = vld [vmem:[%s1515_s0 + $0x10] sm:$0xff] }
   0x2   :  { %850 = vmatprep.subr.bf16.mxu0 %v950_v0  ;;  %v28_v2 = vld [vmem:[%s1515_s0] sm:$0xff]  ;;  %v29_v3 = vld [vmem:[%s1515_s0 + $0x8] sm:$0xff]  ;;  %v31_v6 = vld [vmem:[%s1515_s0 + $0x18] sm:$0xff] }
   0x3   :  { %851 = vmatpush3.bf16.msra.mxu0 %v950_v0  ;;  %v60_v4 = vpack.c.bf16 %v29_v3, %v28_v2  ;;  %v32_v7 = vld [vmem:[%s1515_s0 + $0x20] sm:$0xff]  ;;  %v33_v8 = vld [vmem:[%s1515_s0 + $0x28] sm:$0xff]  ;;  %v61_v9 = vpack.c.bf16 %v31_v6, %v30_v5  ;;  %v34_v11 = vld [vmem:[%s1515_s0 + $0x30] sm:$0xff] }
   0x4   :  { %852 = vmatprep.subr.bf16.mxu0 %v951_v1  ;;  %v62_v10 = vpack.c.bf16 %v33_v8, %v32_v7  ;;  %v35_v12 = vld [vmem:[%s1515_s0 + $0x38] sm:$0xff]  ;;  %v36_v13 = vld [vmem:[%s1515_s0 + $0x40] sm:$0xff]  ;;  %v37_v14 = vld [vmem:[%s1515_s0 + $0x48] sm:$0xff] }
   0x5   :  { %854 = vmatprep.mubr.msk.bf16.mxu0 %vm99_vm0, %v60_v4  ;;  %v952_v15 = vld [vmem:[%s1516_s3] sm:$0xff]   ;;  %v63_v16 = vpack.c.bf16 %v35_v12, %v34_v11  ;;  %v953_v17 = vld [vmem:[%s1516_s3 + $0x8] sm:$0xff]   ;;  %v64_v18 = vpack.c.bf16 %v37_v14, %v36_v13  ;;  %v38_v19 = vld [vmem:[%s1515_s0 + $0x50] sm:$0xff] }
   0x6   :  { %934 = vmatprep.subr.bf16.mxu1 %v952_v15  ;;  %v954_v20 = vld [vmem:[%s1516_s3 + $0x10] sm:$0xff]   ;;  %v39_v21 = vld [vmem:[%s1515_s0 + $0x58] sm:$0xff]  ;;  %v40_v22 = vld [vmem:[%s1515_s0 + $0x60] sm:$0xff] }
   0x7   :  { %853 = vmatpush3.bf16.msra.mxu0 %v951_v1  ;;  %942 = vmatpush3.bf16.msra.mxu1 %v952_v15  ;;  %v41_v23 = vld [vmem:[%s1515_s0 + $0x68] sm:$0xff]  ;;  %v955_v24 = vld [vmem:[%s1516_s3 + $0x18] sm:$0xff]   ;;  %v65_v25 = vpack.c.bf16 %v39_v21, %v38_v19  ;;  %v956_v27 = vld [vmem:[%s1516_s3 + $0x20] sm:$0xff]  }
   0x8   :  { %886 = vmatprep.subr.bf16.mxu0 %v952_v15  ;;  %935 = vmatprep.subr.bf16.mxu1 %v953_v17  ;;  %v66_v26 = vpack.c.bf16 %v41_v23, %v40_v22  ;;  %v42_v28 = vld [vmem:[%s1515_s0 + $0x70] sm:$0xff]  ;;  %v43_v29 = vld [vmem:[%s1515_s0 + $0x78] sm:$0xff]  ;;  %v44_v30 = vld [vmem:[%s1515_s0 + $0x80] sm:$0xff] }
   0x9   :  { %v45_v31 = vld [vmem:[%s1515_s0 + $0x88] sm:$0xff]  ;;  %v67_v33 = vpack.c.bf16 %v43_v29, %v42_v28  ;;  %v46_v35 = vld [vmem:[%s1515_s0 + $0x90] sm:$0xff]  ;;  %v47_v36 = vld [vmem:[%s1515_s0 + $0x98] sm:$0xff] }
   0xa   :  { %855 = vmatmul.mubr.msk.bf16.vlgmr.msra.gmra.mrb[0].mxu0 %vm99_vm0, %v61_v9  ;;  %v957_v32 = vld [vmem:[%s1516_s3 + $0x28] sm:$0xff]   ;;  %v68_v34 = vpack.c.bf16 %v45_v31, %v44_v30  ;;  %v48_v37 = vld [vmem:[%s1515_s0 + $0xa0] sm:$0xff]  ;;  %v69_v39 = vpack.c.bf16 %v47_v36, %v46_v35  ;;  %v50_v41 = vld [vmem:[%s1515_s0 + $0xb0] sm:$0xff] }
   0xb   :  { %858 = vmatprep.mubr.msk.bf16.mxu0 %vm99_vm0, %v62_v10  ;;  %887 = vmatpush3.bf16.msra.mxu0 %v952_v15  ;;  %v49_v38 = vld [vmem:[%s1515_s0 + $0xa8] sm:$0xff]  ;;  %v51_v42 = vld [vmem:[%s1515_s0 + $0xb8] sm:$0xff]  ;;  %v52_v43 = vld [vmem:[%s1515_s0 + $0xc0] sm:$0xff] }
   0xc   :  { %888 = vmatprep.subr.bf16.mxu0 %v953_v17  ;;  %943 = vmatpush3.bf16.msra.mxu1 %v953_v17  ;;  %v70_v40 = vpack.c.bf16 %v49_v38, %v48_v37  ;;  %v53_v44 = vld [vmem:[%s1515_s0 + $0xc8] sm:$0xff]  ;;  %v71_v45 = vpack.c.bf16 %v51_v42, %v50_v41  ;;  %v54_v47 = vld [vmem:[%s1515_s0 + $0xd0] sm:$0xff]  ;;  %v55_v48 = vld [vmem:[%s1515_s0 + $0xd8] sm:$0xff] }
   0xd   :  { %936 = vmatprep.subr.bf16.mxu1 %v954_v20  ;;  %v72_v46 = vpack.c.bf16 %v53_v44, %v52_v43  ;;  %v56_v49 = vld [vmem:[%s1515_s0 + $0xe0] sm:$0xff]  ;;  %v57_v50 = vld [vmem:[%s1515_s0 + $0xe8] sm:$0xff]  ;;  %v73_v51 = vpack.c.bf16 %v55_v48, %v54_v47  ;;  %v58_v53 = vld [vmem:[%s1515_s0 + $0xf0] sm:$0xff] }
   0xe   :  { %v74_v52 = vpack.c.bf16 %v57_v50, %v56_v49  ;;  %v59_v54 = vld [vmem:[%s1515_s0 + $0xf8] sm:$0xff]  ;;  %v958_v56 = vld [vmem:[%s1516_s3 + $0x30] sm:$0xff]   ;;  %v1241_v59 = vld [vmem:[%s1517_s2] ss:$0 sm:$0xff] }
   0xf   :  { %889 = vmatpush3.bf16.msra.mxu0 %v953_v17  ;;  %v75_v55 = vpack.c.bf16 %v59_v54, %v58_v53  ;;  %v959_v57 = vld [vmem:[%s1516_s3 + $0x38] sm:$0xff]  }
  0x10   :  { %890 = vmatprep.subr.bf16.mxu0 %v954_v20  ;;  %944 = vmatpush3.bf16.msra.mxu1 %v954_v20 }
  0x11   :  { %937 = vmatprep.subr.bf16.mxu1 %v955_v24 }
  0x12   :  { %859 = vmatmul.mubr.msk.bf16.gmra.mrb[4].mxu0 %vm99_vm0, %v63_v16 }
  0x13   :  { %862 = vmatprep.mubr.msk.bf16.mxu0 %vm99_vm0, %v64_v18  ;;  %891 = vmatpush3.bf16.msra.mxu0 %v954_v20 }
  0x14   :  { %892 = vmatprep.subr.bf16.mxu0 %v955_v24  ;;  %945 = vmatpush3.bf16.msra.mxu1 %v955_v24 }
  0x15   :  { %938 = vmatprep.subr.bf16.mxu1 %v956_v27 }
  0x17   :  { %893 = vmatpush3.bf16.msra.mxu0 %v955_v24 }
  0x18   :  { %894 = vmatprep.subr.bf16.mxu0 %v956_v27  ;;  %946 = vmatpush3.bf16.msra.mxu1 %v956_v27 }
  0x19   :  { %939 = vmatprep.subr.bf16.mxu1 %v957_v32 }
  0x1a   :  { %863 = vmatmul.mubr.msk.bf16.gmra.mrb[8].mxu0 %vm99_vm0, %v65_v25 }
  0x1b   :  { %866 = vmatprep.mubr.msk.bf16.mxu0 %vm99_vm0, %v66_v26  ;;  %895 = vmatpush3.bf16.msra.mxu0 %v956_v27 }
  0x1c   :  { %896 = vmatprep.subr.bf16.mxu0 %v957_v32  ;;  %947 = vmatpush3.bf16.msra.mxu1 %v957_v32 }
  0x1d   :  { %940 = vmatprep.subr.bf16.mxu1 %v958_v56 }
  0x1f   :  { %897 = vmatpush3.bf16.msra.mxu0 %v957_v32 }
  0x20   :  { %898 = vmatprep.subr.bf16.mxu0 %v958_v56  ;;  %948 = vmatpush3.bf16.msra.mxu1 %v958_v56 }
  0x21   :  { %941 = vmatprep.subr.bf16.mxu1 %v959_v57 }
  0x22   :  { %867 = vmatmul.mubr.msk.bf16.gmra.mrb[12].mxu0 %vm99_vm0, %v67_v33 }
  0x23   :  { %870 = vmatprep.mubr.msk.bf16.mxu0 %vm99_vm0, %v68_v34  ;;  %899 = vmatpush3.bf16.msra.mxu0 %v958_v56 }
  0x24   :  { %900 = vmatprep.subr.bf16.mxu0 %v959_v57  ;;  %949 = vmatpush3.bf16.msra.mxu1 %v959_v57 }
  0x27   :  { %901 = vmatpush3.bf16.msra.mxu0 %v959_v57 }
  0x2a   :  { %871 = vmatmul.mubr.msk.bf16.gmra.mrb[16].mxu0 %vm99_vm0, %v69_v39 }
  0x2b   :  { %874 = vmatprep.mubr.msk.bf16.mxu0 %vm99_vm0, %v70_v40 }
  0x32   :  { %875 = vmatmul.mubr.msk.bf16.gmra.mrb[20].mxu0 %vm99_vm0, %v71_v45 }
  0x33   :  { %878 = vmatprep.mubr.msk.bf16.mxu0 %vm99_vm0, %v72_v46 }
  0x3a   :  { %879 = vmatmul.mubr.msk.bf16.gmra.mrb[24].mxu0 %vm99_vm0, %v73_v51 }
  0x3b   :  { %882 = vmatprep.mubr.msk.bf16.mxu0 %vm99_vm0, %v74_v52 }
  0x42   :  { %883 = vmatmul.mubr.msk.bf16.gmra.mrb[28].mxu0 %vm99_vm0, %v75_v55 }
  0xdd   :  { %v856_v58 = vpop.f32.mrb[0].mxu0 }
  0xde   :  { %v182_v60 = vpop.f32.mrb[1].mxu0  ;;  %v191_v62 = vadd.f32 %v856_v58, %v1241_v59 }
  0xdf   :  { %v857_v61 = vpop.f32.mrb[2].mxu0  ;;  %v183_v1 = vadd.f32 %v1241_v59, %v182_v60 }
  0xe0   :  { %v194_v63 = vadd.f32 %v857_v61, %v1241_v59  ;;  %v185_v0 = vpop.f32.mrb[3].mxu0 }
  0xe1   :  { %v186_v2 = vadd.f32 %v1241_v59, %v185_v0 }
  0xe2   :  { %v310_v3 = vpack.c.bf16 %v194_v63, %v191_v62 }
  0xe3   :  { %v309_v4 = vpack.c.bf16 %v186_v2, %v183_v1 }
  0xe5   :  { %960 = vtanh.bf16 %v309_v4  ;;  %v860_v5 = vpop.f32.mrb[4].mxu0 }
  0xe6   :  { %962 = vtanh.bf16 %v310_v3  ;;  %v198_v6 = vpop.f32.mrb[5].mxu0  ;;  %v207_v8 = vadd.f32 %v860_v5, %v1241_v59 }
  0xe7   :  { %v861_v7 = vpop.f32.mrb[6].mxu0  ;;  %v199_v11 = vadd.f32 %v1241_v59, %v198_v6 }
  0xe8   :  { %v210_v9 = vadd.f32 %v861_v7, %v1241_v59  ;;  %v201_v10 = vpop.f32.mrb[7].mxu0 }
  0xe9   :  { %v202_v12 = vadd.f32 %v1241_v59, %v201_v10 }
  0xea   :  { %v312_v13 = vpack.c.bf16 %v210_v9, %v207_v8 }
  0xeb   :  { %v311_v14 = vpack.c.bf16 %v202_v12, %v199_v11 }
  0xed   :  { %v864_v15 = vpop.f32.mrb[8].mxu0  ;;  %964 = vtanh.bf16 %v311_v14 }
  0xee   :  { %966 = vtanh.bf16 %v312_v13  ;;  %v214_v16 = vpop.f32.mrb[9].mxu0  ;;  %v223_v19 = vadd.f32 %v864_v15, %v1241_v59 }
  0xef   :  { %v865_v17 = vpop.f32.mrb[10].mxu0  ;;  %v215_v23 = vadd.f32 %v1241_v59, %v214_v16 }
  0xf0   :  { %v961_v18 = vpop.eup %960  ;;  %v226_v20 = vadd.f32 %v865_v17, %v1241_v59  ;;  %v217_v21 = vpop.f32.mrb[11].mxu0 }
  0xf1   :  { %v963_v22 = vpop.eup %962  ;;  %v218_v24 = vadd.f32 %v1241_v59, %v217_v21  ;;  %902 = vmatprep.mubr.bf16.mxu0 %v961_v18 }
  0xf2   :  { %v314_v25 = vpack.c.bf16 %v226_v20, %v223_v19  ;;  %903 = vmatmul.mubr.bf16.vlgmr.msra.gmra.mrb[32].mxu0 %v963_v22 }
  0xf3   :  { %v313_v26 = vpack.c.bf16 %v218_v24, %v215_v23 }
  0xf5   :  { %968 = vtanh.bf16 %v313_v26  ;;  %v868_v27 = vpop.f32.mrb[12].mxu0 }
  0xf6   :  { %970 = vtanh.bf16 %v314_v25  ;;  %v230_v28 = vpop.f32.mrb[13].mxu0  ;;  %v239_v31 = vadd.f32 %v868_v27, %v1241_v59 }
  0xf7   :  { %v869_v29 = vpop.f32.mrb[14].mxu0  ;;  %v231_v35 = vadd.f32 %v1241_v59, %v230_v28  ;;  %v1278_v28 = vld [vmem:[%s1518_s4] ss:$0 sm:$0xff] }
  0xf8   :  { %v965_v30 = vpop.eup %964  ;;  %v242_v32 = vadd.f32 %v869_v29, %v1241_v59  ;;  %v233_v33 = vpop.f32.mrb[15].mxu0 }
  0xf9   :  { %v967_v34 = vpop.eup %966  ;;  %v234_v36 = vadd.f32 %v1241_v59, %v233_v33  ;;  %906 = vmatprep.mubr.bf16.mxu1 %v965_v30 }
  0xfa   :  { %v316_v37 = vpack.c.bf16 %v242_v32, %v239_v31  ;;  %907 = vmatmul.mubr.bf16.vlgmr.msra.gmra.mrb[0].mxu1 %v967_v34 }
  0xfb   :  { %v315_v38 = vpack.c.bf16 %v234_v36, %v231_v35 }
  0xfd   :  { %972 = vtanh.bf16 %v315_v38  ;;  %v872_v39 = vpop.f32.mrb[16].mxu0 }
  0xfe   :  { %974 = vtanh.bf16 %v316_v37  ;;  %v246_v40 = vpop.f32.mrb[17].mxu0  ;;  %v255_v43 = vadd.f32 %v872_v39, %v1241_v59 }
  0xff   :  { %v873_v41 = vpop.f32.mrb[18].mxu0  ;;  %v247_v47 = vadd.f32 %v1241_v59, %v246_v40 }
 0x100   :  { %v969_v42 = vpop.eup %968  ;;  %v258_v44 = vadd.f32 %v873_v41, %v1241_v59  ;;  %v249_v45 = vpop.f32.mrb[19].mxu0 }
 0x101   :  { %v971_v46 = vpop.eup %970  ;;  %v250_v48 = vadd.f32 %v1241_v59, %v249_v45  ;;  %910 = vmatprep.mubr.bf16.mxu1 %v969_v42 }
 0x102   :  { %v318_v49 = vpack.c.bf16 %v258_v44, %v255_v43  ;;  %911 = vmatmul.mubr.bf16.gmra.mrb[4].mxu1 %v971_v46  ;;  %v1290_v43 = vld [vmem:[%s1519_s5] ss:$0 sm:$0xff] }
 0x103   :  { %v317_v50 = vpack.c.bf16 %v250_v48, %v247_v47 }
 0x105   :  { %976 = vtanh.bf16 %v317_v50  ;;  %v876_v51 = vpop.f32.mrb[20].mxu0 }
 0x106   :  { %978 = vtanh.bf16 %v318_v49  ;;  %v262_v52 = vpop.f32.mrb[21].mxu0  ;;  %v271_v55 = vadd.f32 %v876_v51, %v1241_v59 }
 0x107   :  { %v877_v53 = vpop.f32.mrb[22].mxu0  ;;  %v263_v60 = vadd.f32 %v1241_v59, %v262_v52 }
 0x108   :  { %v973_v54 = vpop.eup %972  ;;  %v274_v56 = vadd.f32 %v877_v53, %v1241_v59  ;;  %v265_v57 = vpop.f32.mrb[23].mxu0 }
 0x109   :  { %v975_v58 = vpop.eup %974  ;;  %v266_v61 = vadd.f32 %v1241_v59, %v265_v57  ;;  %914 = vmatprep.mubr.bf16.mxu1 %v973_v54 }
 0x10a   :  { %v320_v62 = vpack.c.bf16 %v274_v56, %v271_v55  ;;  %915 = vmatmul.mubr.bf16.gmra.mrb[8].mxu1 %v975_v58 }
 0x10b   :  { %v319_v63 = vpack.c.bf16 %v266_v61, %v263_v60 }
 0x10d   :  { %980 = vtanh.bf16 %v319_v63  ;;  %v880_v0 = vpop.f32.mrb[24].mxu0 }
 0x10e   :  { %982 = vtanh.bf16 %v320_v62  ;;  %v278_v1 = vpop.f32.mrb[25].mxu0  ;;  %v287_v4 = vadd.f32 %v880_v0, %v1241_v59 }
 0x10f   :  { %v881_v2 = vpop.f32.mrb[26].mxu0  ;;  %v279_v8 = vadd.f32 %v1241_v59, %v278_v1 }
 0x110   :  { %v977_v3 = vpop.eup %976  ;;  %v290_v5 = vadd.f32 %v881_v2, %v1241_v59  ;;  %v281_v6 = vpop.f32.mrb[27].mxu0 }
 0x111   :  { %v979_v7 = vpop.eup %978  ;;  %v282_v9 = vadd.f32 %v1241_v59, %v281_v6  ;;  %918 = vmatprep.mubr.bf16.mxu1 %v977_v3 }
 0x112   :  { %v322_v10 = vpack.c.bf16 %v290_v5, %v287_v4  ;;  %919 = vmatmul.mubr.bf16.gmra.mrb[12].mxu1 %v979_v7 }
 0x113   :  { %v321_v11 = vpack.c.bf16 %v282_v9, %v279_v8 }
 0x115   :  { %984 = vtanh.bf16 %v321_v11  ;;  %v884_v12 = vpop.f32.mrb[28].mxu0 }
 0x116   :  { %986 = vtanh.bf16 %v322_v10  ;;  %v294_v13 = vpop.f32.mrb[29].mxu0  ;;  %v303_v16 = vadd.f32 %v884_v12, %v1241_v59 }
 0x117   :  { %v885_v14 = vpop.f32.mrb[30].mxu0  ;;  %v295_v20 = vadd.f32 %v1241_v59, %v294_v13 }
 0x118   :  { %v981_v15 = vpop.eup %980  ;;  %v306_v17 = vadd.f32 %v885_v14, %v1241_v59  ;;  %v297_v18 = vpop.f32.mrb[31].mxu0 }
 0x119   :  { %v983_v19 = vpop.eup %982  ;;  %v298_v21 = vadd.f32 %v1241_v59, %v297_v18  ;;  %922 = vmatprep.mubr.bf16.mxu1 %v981_v15 }
 0x11a   :  { %v324_v22 = vpack.c.bf16 %v306_v17, %v303_v16  ;;  %923 = vmatmul.mubr.bf16.gmra.mrb[16].mxu1 %v983_v19 }
 0x11b   :  { %v323_v23 = vpack.c.bf16 %v298_v21, %v295_v20 }
 0x11d   :  { %988 = vtanh.bf16 %v323_v23 }
 0x11e   :  { %990 = vtanh.bf16 %v324_v22 }
 0x120   :  { %v985_v24 = vpop.eup %984 }
 0x121   :  { %v987_v25 = vpop.eup %986  ;;  %926 = vmatprep.mubr.bf16.mxu1 %v985_v24 }
 0x122   :  { %927 = vmatmul.mubr.bf16.gmra.mrb[20].mxu1 %v987_v25 }
 0x128   :  { %v989_v26 = vpop.eup %988 }
 0x129   :  { %v991_v27 = vpop.eup %990  ;;  %930 = vmatprep.mubr.bf16.mxu1 %v989_v26 }
 0x12a   :  { %931 = vmatmul.mubr.bf16.gmra.mrb[24].mxu1 %v991_v27 }
 0x1c5   :  { %v904_v59 = vpop.f32.mrb[32].mxu0 }
 0x1c6   :  { %v455_v29 = vadd.f32 %v904_v59, %v1278_v28  ;;  %v446_v30 = vpop.f32.mrb[33].mxu0 }
 0x1c7   :  { %v447_v31 = vadd.f32 %v1278_v28, %v446_v30  ;;  %v905_v32 = vpop.f32.mrb[34].mxu0 }
 0x1c8   :  { %992 = vtanh.f32 %v455_v29  ;;  %v458_v33 = vadd.f32 %v905_v32, %v1278_v28  ;;  %v449_v34 = vpop.f32.mrb[35].mxu0 }
 0x1c9   :  { %994 = vtanh.f32 %v447_v31  ;;  %v450_v35 = vadd.f32 %v1278_v28, %v449_v34 }
 0x1ca   :  { %996 = vtanh.f32 %v458_v33 }
 0x1cb   :  { %998 = vtanh.f32 %v450_v35 }
 0x1cd   :  { %v908_v36 = vpop.f32.mrb[0].mxu1 }
 0x1ce   :  { %v471_v37 = vadd.f32 %v908_v36, %v1278_v28  ;;  %v462_v38 = vpop.f32.mrb[1].mxu1 }
 0x1cf   :  { %v463_v39 = vadd.f32 %v1278_v28, %v462_v38  ;;  %v909_v40 = vpop.f32.mrb[2].mxu1 }
 0x1d0   :  { %1000 = vtanh.f32 %v471_v37  ;;  %v474_v41 = vadd.f32 %v909_v40, %v1278_v28  ;;  %v465_v42 = vpop.f32.mrb[3].mxu1 }
 0x1d1   :  { %v466_v44 = vadd.f32 %v1278_v28, %v465_v42 }
 0x1d2   :  { %v993_v45 = vpop.eup %992  ;;  %1002 = vtanh.f32 %v474_v41 }
 0x1d3   :  { %v995_v46 = vpop.eup %994  ;;  %1004 = vtanh.f32 %v463_v39  ;;  %v614_v47 = vmul.f32 %v993_v45, %v1290_v43 }
 0x1d4   :  { %v997_v48 = vpop.eup %996  ;;  %1006 = vtanh.f32 %v466_v44  ;;  %v612_v49 = vmul.f32 %v995_v46, %v1290_v43 }
 0x1d5   :  { %v999_v50 = vpop.eup %998  ;;  %v912_v51 = vpop.f32.mrb[4].mxu1  ;;  %648 = vadd.xlane.f32.xlu1 %v614_v47  ;;  %v615_v56 = vmul.f32 %v997_v48, %v1290_v43 }
 0x1d6   :  { %v487_v52 = vadd.f32 %v912_v51, %v1278_v28  ;;  %v478_v53 = vpop.f32.mrb[5].mxu1  ;;  %644 = vadd.xlane.f32.xlu0 %v612_v49  ;;  %v613_v60 = vmul.f32 %v999_v50, %v1290_v43 }
 0x1d7   :  { %v479_v54 = vadd.f32 %v1278_v28, %v478_v53  ;;  %v913_v55 = vpop.f32.mrb[6].mxu1 }
 0x1d8   :  { %1008 = vtanh.f32 %v487_v52  ;;  %v490_v57 = vadd.f32 %v913_v55, %v1278_v28  ;;  %v481_v58 = vpop.f32.mrb[7].mxu1 }
 0x1d9   :  { %v482_v61 = vadd.f32 %v1278_v28, %v481_v58  ;;  %650 = vadd.xlane.f32.xlu1 %v615_v56 }
 0x1da   :  { %v1001_v62 = vpop.eup %1000  ;;  %1010 = vtanh.f32 %v490_v57  ;;  %646 = vadd.xlane.f32.xlu0 %v613_v60 }
 0x1db   :  { %1012 = vtanh.f32 %v479_v54  ;;  %v618_v63 = vmul.f32 %v1001_v62, %v1290_v43 }
 0x1dc   :  { %v1003_v0 = vpop.eup %1002  ;;  %1014 = vtanh.f32 %v482_v61 }
 0x1dd   :  { %v1005_v1 = vpop.eup %1004  ;;  %v916_v2 = vpop.f32.mrb[8].mxu1  ;;  %v619_v3 = vmul.f32 %v1003_v0, %v1290_v43 }
 0x1de   :  { %v1007_v4 = vpop.eup %1006  ;;  %v503_v5 = vadd.f32 %v916_v2, %v1278_v28  ;;  %v494_v6 = vpop.f32.mrb[9].mxu1  ;;  %656 = vadd.xlane.f32.xlu0 %v618_v63  ;;  %v616_v11 = vmul.f32 %v1005_v1, %v1290_v43 }
 0x1df   :  { %v495_v7 = vadd.f32 %v1278_v28, %v494_v6  ;;  %v917_v8 = vpop.f32.mrb[10].mxu1  ;;  %658 = vadd.xlane.f32.xlu1 %v619_v3  ;;  %v617_v13 = vmul.f32 %v1007_v4, %v1290_v43 }
 0x1e0   :  { %1016 = vtanh.f32 %v503_v5  ;;  %v506_v9 = vadd.f32 %v917_v8, %v1278_v28  ;;  %v497_v10 = vpop.f32.mrb[11].mxu1 }
 0x1e1   :  { %v498_v12 = vadd.f32 %v1278_v28, %v497_v10 }
 0x1e2   :  { %v1009_v14 = vpop.eup %1008  ;;  %1018 = vtanh.f32 %v506_v9  ;;  %652 = vadd.xlane.f32.xlu0 %v616_v11 }
 0x1e3   :  { %1020 = vtanh.f32 %v495_v7  ;;  %654 = vadd.xlane.f32.xlu1 %v617_v13  ;;  %v622_v15 = vmul.f32 %v1009_v14, %v1290_v43 }
 0x1e4   :  { %v1011_v16 = vpop.eup %1010  ;;  %1022 = vtanh.f32 %v498_v12 }
 0x1e5   :  { %v1013_v17 = vpop.eup %1012  ;;  %v920_v18 = vpop.f32.mrb[12].mxu1  ;;  %v623_v19 = vmul.f32 %v1011_v16, %v1290_v43 }
 0x1e6   :  { %v1015_v20 = vpop.eup %1014  ;;  %v519_v21 = vadd.f32 %v920_v18, %v1278_v28  ;;  %v510_v22 = vpop.f32.mrb[13].mxu1  ;;  %664 = vadd.xlane.f32.xlu0 %v622_v15  ;;  %v620_v27 = vmul.f32 %v1013_v17, %v1290_v43 }
 0x1e7   :  { %v511_v23 = vadd.f32 %v1278_v28, %v510_v22  ;;  %v921_v24 = vpop.f32.mrb[14].mxu1  ;;  %666 = vadd.xlane.f32.xlu1 %v623_v19  ;;  %v621_v29 = vmul.f32 %v1015_v20, %v1290_v43 }
 0x1e8   :  { %1024 = vtanh.f32 %v519_v21  ;;  %v522_v25 = vadd.f32 %v921_v24, %v1278_v28  ;;  %v513_v26 = vpop.f32.mrb[15].mxu1 }
 0x1e9   :  { %v514_v59 = vadd.f32 %v1278_v28, %v513_v26 }
 0x1ea   :  { %v1017_v30 = vpop.eup %1016  ;;  %1026 = vtanh.f32 %v522_v25  ;;  %660 = vadd.xlane.f32.xlu0 %v620_v27 }
 0x1eb   :  { %1028 = vtanh.f32 %v511_v23  ;;  %662 = vadd.xlane.f32.xlu1 %v621_v29  ;;  %v626_v31 = vmul.f32 %v1017_v30, %v1290_v43 }
 0x1ec   :  { %v1019_v32 = vpop.eup %1018  ;;  %1030 = vtanh.f32 %v514_v59 }
 0x1ed   :  { %v1021_v33 = vpop.eup %1020  ;;  %v924_v34 = vpop.f32.mrb[16].mxu1  ;;  %v627_v35 = vmul.f32 %v1019_v32, %v1290_v43 }
 0x1ee   :  { %v1023_v36 = vpop.eup %1022  ;;  %v535_v37 = vadd.f32 %v924_v34, %v1278_v28  ;;  %v526_v38 = vpop.f32.mrb[17].mxu1  ;;  %672 = vadd.xlane.f32.xlu0 %v626_v31  ;;  %v624_v44 = vmul.f32 %v1021_v33, %v1290_v43  ;;  %v1352_v31 = vstv %s1520_s6 }
 0x1ef   :  { %v527_v39 = vadd.f32 %v1278_v28, %v526_v38  ;;  %v925_v40 = vpop.f32.mrb[18].mxu1  ;;  %674 = vadd.xlane.f32.xlu1 %v627_v35  ;;  %v625_v46 = vmul.f32 %v1023_v36, %v1290_v43 }
 0x1f0   :  { %1032 = vtanh.f32 %v535_v37  ;;  %v538_v41 = vadd.f32 %v925_v40, %v1278_v28  ;;  %v529_v42 = vpop.f32.mrb[19].mxu1 }
 0x1f1   :  { %v530_v45 = vadd.f32 %v1278_v28, %v529_v42 }
 0x1f2   :  { %v1025_v47 = vpop.eup %1024  ;;  %1034 = vtanh.f32 %v538_v41  ;;  %668 = vadd.xlane.f32.xlu0 %v624_v44 }
 0x1f3   :  { %1036 = vtanh.f32 %v527_v39  ;;  %670 = vadd.xlane.f32.xlu1 %v625_v46  ;;  %v630_v48 = vmul.f32 %v1025_v47, %v1290_v43 }
 0x1f4   :  { %v1027_v49 = vpop.eup %1026  ;;  %1038 = vtanh.f32 %v530_v45 }
 0x1f5   :  { %v1029_v50 = vpop.eup %1028  ;;  %v928_v51 = vpop.f32.mrb[20].mxu1  ;;  %v631_v52 = vmul.f32 %v1027_v49, %v1290_v43 }
 0x1f6   :  { %v1031_v53 = vpop.eup %1030  ;;  %v551_v54 = vadd.f32 %v928_v51, %v1278_v28  ;;  %v542_v55 = vpop.f32.mrb[21].mxu1  ;;  %680 = vadd.xlane.f32.xlu0 %v630_v48  ;;  %v628_v61 = vmul.f32 %v1029_v50, %v1290_v43 }
 0x1f7   :  { %v543_v56 = vadd.f32 %v1278_v28, %v542_v55  ;;  %v929_v57 = vpop.f32.mrb[22].mxu1  ;;  %682 = vadd.xlane.f32.xlu1 %v631_v52  ;;  %v629_v63 = vmul.f32 %v1031_v53, %v1290_v43 }
 0x1f8   :  { %1040 = vtanh.f32 %v551_v54  ;;  %v554_v58 = vadd.f32 %v929_v57, %v1278_v28  ;;  %v545_v60 = vpop.f32.mrb[23].mxu1 }
 0x1f9   :  { %v546_v62 = vadd.f32 %v1278_v28, %v545_v60 }
 0x1fa   :  { %v1033_v0 = vpop.eup %1032  ;;  %1042 = vtanh.f32 %v554_v58  ;;  %676 = vadd.xlane.f32.xlu0 %v628_v61 }
 0x1fb   :  { %1044 = vtanh.f32 %v543_v56  ;;  %678 = vadd.xlane.f32.xlu1 %v629_v63  ;;  %v634_v1 = vmul.f32 %v1033_v0, %v1290_v43 }
 0x1fc   :  { %v1035_v2 = vpop.eup %1034  ;;  %1046 = vtanh.f32 %v546_v62 }
 0x1fd   :  { %v1037_v3 = vpop.eup %1036  ;;  %v932_v4 = vpop.f32.mrb[24].mxu1  ;;  %v635_v5 = vmul.f32 %v1035_v2, %v1290_v43 }
 0x1fe   :  { %v1039_v6 = vpop.eup %1038  ;;  %v567_v7 = vadd.f32 %v932_v4, %v1278_v28  ;;  %v558_v8 = vpop.f32.mrb[25].mxu1  ;;  %688 = vadd.xlane.f32.xlu0 %v634_v1  ;;  %v632_v12 = vmul.f32 %v1037_v3, %v1290_v43 }
 0x1ff   :  { %v559_v9 = vadd.f32 %v1278_v28, %v558_v8  ;;  %v933_v10 = vpop.f32.mrb[26].mxu1  ;;  %690 = vadd.xlane.f32.xlu1 %v635_v5  ;;  %v633_v15 = vmul.f32 %v1039_v6, %v1290_v43 }
 0x200   :  { %v561_v11 = vpop.f32.mrb[27].mxu1  ;;  %v570_v13 = vadd.f32 %v933_v10, %v1278_v28 }
 0x201   :  { %1048 = vtanh.f32 %v559_v9  ;;  %v562_v14 = vadd.f32 %v1278_v28, %v561_v11 }
 0x202   :  { %v1041_v16 = vpop.eup %1040  ;;  %1050 = vtanh.f32 %v567_v7  ;;  %684 = vadd.xlane.f32.xlu0 %v632_v12 }
 0x203   :  { %1052 = vtanh.f32 %v562_v14  ;;  %686 = vadd.xlane.f32.xlu1 %v633_v15  ;;  %v638_v17 = vmul.f32 %v1041_v16, %v1290_v43 }
 0x204   :  { %v1043_v18 = vpop.eup %1042  ;;  %1054 = vtanh.f32 %v570_v13 }
 0x205   :  { %v1045_v19 = vpop.eup %1044  ;;  %v639_v20 = vmul.f32 %v1043_v18, %v1290_v43 }
 0x206   :  { %v1047_v21 = vpop.eup %1046  ;;  %696 = vadd.xlane.f32.xlu0 %v638_v17  ;;  %v636_v22 = vmul.f32 %v1045_v19, %v1290_v43 }
 0x207   :  { %698 = vadd.xlane.f32.xlu1 %v639_v20  ;;  %v637_v28 = vmul.f32 %v1047_v21, %v1290_v43 }
 0x20a   :  { %692 = vadd.xlane.f32.xlu0 %v636_v22 }
 0x20b   :  { %v1049_v23 = vpop.eup %1048  ;;  %694 = vadd.xlane.f32.xlu1 %v637_v28 }
 0x20c   :  { %v1051_v24 = vpop.eup %1050  ;;  %v640_v25 = vmul.f32 %v1049_v23, %v1290_v43 }
 0x20d   :  { %v1053_v26 = vpop.eup %1052  ;;  %v642_v29 = vmul.f32 %v1051_v24, %v1290_v43 }
 0x20e   :  { %700 = vadd.xlane.f32.xlu0 %v640_v25  ;;  %v641_v27 = vmul.f32 %v1053_v26, %v1290_v43  ;;  %v1055_v59 = vpop.eup %1054 }
 0x20f   :  { %v643_v30 = vmul.f32 %v1055_v59, %v1290_v43 }
 0x210   :  { %702 = vadd.xlane.f32.xlu1 %v641_v27 }
 0x212   :  { %704 = vadd.xlane.f32.xlu0 %v642_v29 }
 0x214   :  { %706 = vadd.xlane.f32.xlu1 %v643_v30 }
 0x262   :  { %v649_v32 = vpop.xlane.xlu1 %648 }
 0x263   :  { %v712_v33 = vadd.f32 %v1352_v31, %v649_v32  ;;  %v645_v34 = vpop.xlane.xlu0 %644 }
 0x264   :  { %v710_v35 = vadd.f32 %v1352_v31, %v645_v34 }
 0x265   :  { %745 = vst.msk [vmem:[%s1521_s7 + $0x10] sm:$0xff] %vm742_vm1, %v712_v33 }
 0x266   :  { %743 = vst.msk [vmem:[%s1521_s7] sm:$0xff] %vm742_vm1, %v710_v35  ;;  %v651_v43 = vpop.xlane.xlu1 %650 }
 0x267   :  { %v713_v36 = vadd.f32 %v1352_v31, %v651_v43  ;;  %v647_v37 = vpop.xlane.xlu0 %646 }
 0x268   :  { %v711_v38 = vadd.f32 %v1352_v31, %v647_v37 }
 0x269   :  { %746 = vst.msk [vmem:[%s1521_s7 + $0x18] sm:$0xff] %vm742_vm1, %v713_v36 }
 0x26a   :  { %744 = vst.msk [vmem:[%s1521_s7 + $0x8] sm:$0xff] %vm742_vm1, %v711_v38 }
 0x26b   :  { %v657_v39 = vpop.xlane.xlu0 %656 }
 0x26c   :  { %v716_v40 = vadd.f32 %v1352_v31, %v657_v39  ;;  %v659_v41 = vpop.xlane.xlu1 %658 }
 0x26d   :  { %v717_v42 = vadd.f32 %v1352_v31, %v659_v41 }
 0x26e   :  { %749 = vst.msk [vmem:[%s1521_s7 + $0x30] sm:$0xff] %vm742_vm1, %v716_v40 }
 0x26f   :  { %750 = vst.msk [vmem:[%s1521_s7 + $0x38] sm:$0xff] %vm742_vm1, %v717_v42  ;;  %v653_v44 = vpop.xlane.xlu0 %652 }
 0x270   :  { %v714_v45 = vadd.f32 %v1352_v31, %v653_v44  ;;  %v655_v46 = vpop.xlane.xlu1 %654 }
 0x271   :  { %v715_v47 = vadd.f32 %v1352_v31, %v655_v46 }
 0x272   :  { %747 = vst.msk [vmem:[%s1521_s7 + $0x20] sm:$0xff] %vm742_vm1, %v714_v45 }
 0x273   :  { %748 = vst.msk [vmem:[%s1521_s7 + $0x28] sm:$0xff] %vm742_vm1, %v715_v47  ;;  %v665_v48 = vpop.xlane.xlu0 %664 }
 0x274   :  { %v720_v49 = vadd.f32 %v1352_v31, %v665_v48  ;;  %v667_v50 = vpop.xlane.xlu1 %666 }
 0x275   :  { %v721_v51 = vadd.f32 %v1352_v31, %v667_v50 }
 0x276   :  { %753 = vst.msk [vmem:[%s1521_s7 + $0x50] sm:$0xff] %vm742_vm1, %v720_v49 }
 0x277   :  { %754 = vst.msk [vmem:[%s1521_s7 + $0x58] sm:$0xff] %vm742_vm1, %v721_v51  ;;  %v661_v52 = vpop.xlane.xlu0 %660 }
 0x278   :  { %v718_v53 = vadd.f32 %v1352_v31, %v661_v52  ;;  %v663_v54 = vpop.xlane.xlu1 %662 }
 0x279   :  { %v719_v55 = vadd.f32 %v1352_v31, %v663_v54 }
 0x27a   :  { %751 = vst.msk [vmem:[%s1521_s7 + $0x40] sm:$0xff] %vm742_vm1, %v718_v53 }
 0x27b   :  { %752 = vst.msk [vmem:[%s1521_s7 + $0x48] sm:$0xff] %vm742_vm1, %v719_v55  ;;  %v673_v56 = vpop.xlane.xlu0 %672 }
 0x27c   :  { %v724_v57 = vadd.f32 %v1352_v31, %v673_v56  ;;  %v675_v58 = vpop.xlane.xlu1 %674 }
 0x27d   :  { %v725_v60 = vadd.f32 %v1352_v31, %v675_v58 }
 0x27e   :  { %757 = vst.msk [vmem:[%s1521_s7 + $0x70] sm:$0xff] %vm742_vm1, %v724_v57 }
 0x27f   :  { %758 = vst.msk [vmem:[%s1521_s7 + $0x78] sm:$0xff] %vm742_vm1, %v725_v60  ;;  %v669_v61 = vpop.xlane.xlu0 %668 }
 0x280   :  { %v722_v62 = vadd.f32 %v1352_v31, %v669_v61  ;;  %v671_v63 = vpop.xlane.xlu1 %670 }
 0x281   :  { %v723_v0 = vadd.f32 %v1352_v31, %v671_v63 }
 0x282   :  { %755 = vst.msk [vmem:[%s1521_s7 + $0x60] sm:$0xff] %vm742_vm1, %v722_v62 }
 0x283   :  { %756 = vst.msk [vmem:[%s1521_s7 + $0x68] sm:$0xff] %vm742_vm1, %v723_v0  ;;  %v681_v1 = vpop.xlane.xlu0 %680 }
 0x284   :  { %v728_v2 = vadd.f32 %v1352_v31, %v681_v1  ;;  %v683_v3 = vpop.xlane.xlu1 %682 }
 0x285   :  { %v729_v4 = vadd.f32 %v1352_v31, %v683_v3 }
 0x286   :  { %761 = vst.msk [vmem:[%s1521_s7 + $0x90] sm:$0xff] %vm742_vm1, %v728_v2 }
 0x287   :  { %762 = vst.msk [vmem:[%s1521_s7 + $0x98] sm:$0xff] %vm742_vm1, %v729_v4  ;;  %v677_v5 = vpop.xlane.xlu0 %676 }
 0x288   :  { %v726_v6 = vadd.f32 %v1352_v31, %v677_v5  ;;  %v679_v7 = vpop.xlane.xlu1 %678 }
 0x289   :  { %v727_v8 = vadd.f32 %v1352_v31, %v679_v7 }
 0x28a   :  { %759 = vst.msk [vmem:[%s1521_s7 + $0x80] sm:$0xff] %vm742_vm1, %v726_v6 }
 0x28b   :  { %760 = vst.msk [vmem:[%s1521_s7 + $0x88] sm:$0xff] %vm742_vm1, %v727_v8  ;;  %v689_v9 = vpop.xlane.xlu0 %688 }
 0x28c   :  { %v732_v10 = vadd.f32 %v1352_v31, %v689_v9  ;;  %v691_v11 = vpop.xlane.xlu1 %690 }
 0x28d   :  { %v733_v12 = vadd.f32 %v1352_v31, %v691_v11 }
 0x28e   :  { %765 = vst.msk [vmem:[%s1521_s7 + $0xb0] sm:$0xff] %vm742_vm1, %v732_v10 }
 0x28f   :  { %766 = vst.msk [vmem:[%s1521_s7 + $0xb8] sm:$0xff] %vm742_vm1, %v733_v12  ;;  %v685_v13 = vpop.xlane.xlu0 %684 }
 0x290   :  { %v730_v14 = vadd.f32 %v1352_v31, %v685_v13  ;;  %v687_v15 = vpop.xlane.xlu1 %686 }
 0x291   :  { %v731_v16 = vadd.f32 %v1352_v31, %v687_v15 }
 0x292   :  { %763 = vst.msk [vmem:[%s1521_s7 + $0xa0] sm:$0xff] %vm742_vm1, %v730_v14 }
 0x293   :  { %764 = vst.msk [vmem:[%s1521_s7 + $0xa8] sm:$0xff] %vm742_vm1, %v731_v16  ;;  %v697_v17 = vpop.xlane.xlu0 %696 }
 0x294   :  { %v736_v18 = vadd.f32 %v1352_v31, %v697_v17  ;;  %v699_v19 = vpop.xlane.xlu1 %698 }
 0x295   :  { %v737_v20 = vadd.f32 %v1352_v31, %v699_v19 }
 0x296   :  { %769 = vst.msk [vmem:[%s1521_s7 + $0xd0] sm:$0xff] %vm742_vm1, %v736_v18 }
 0x297   :  { %770 = vst.msk [vmem:[%s1521_s7 + $0xd8] sm:$0xff] %vm742_vm1, %v737_v20  ;;  %v693_v21 = vpop.xlane.xlu0 %692 }
 0x298   :  { %v734_v22 = vadd.f32 %v1352_v31, %v693_v21  ;;  %v695_v28 = vpop.xlane.xlu1 %694 }
 0x299   :  { %v735_v23 = vadd.f32 %v1352_v31, %v695_v28 }
 0x29a   :  { %767 = vst.msk [vmem:[%s1521_s7 + $0xc0] sm:$0xff] %vm742_vm1, %v734_v22 }
 0x29b   :  { %768 = vst.msk [vmem:[%s1521_s7 + $0xc8] sm:$0xff] %vm742_vm1, %v735_v23  ;;  %v701_v24 = vpop.xlane.xlu0 %700 }
 0x29c   :  { %v738_v25 = vadd.f32 %v1352_v31, %v701_v24 }
 0x29d   :  { %v703_v26 = vpop.xlane.xlu1 %702 }
 0x29e   :  { %771 = vst.msk [vmem:[%s1521_s7 + $0xe0] sm:$0xff] %vm742_vm1, %v738_v25  ;;  %v739_v27 = vadd.f32 %v1352_v31, %v703_v26 }
 0x29f   :  { %v705_v59 = vpop.xlane.xlu0 %704 }
 0x2a0   :  { %772 = vst.msk [vmem:[%s1521_s7 + $0xe8] sm:$0xff] %vm742_vm1, %v739_v27  ;;  %v740_v29 = vadd.f32 %v1352_v31, %v705_v59 }
 0x2a1   :  { %v707_v30 = vpop.xlane.xlu1 %706 }
 0x2a2   :  { %773 = vst.msk [vmem:[%s1521_s7 + $0xf0] sm:$0xff] %vm742_vm1, %v740_v29  ;;  %v741_v32 = vadd.f32 %v1352_v31, %v707_v30 }
 0x2a4   :  { %774 = vst.msk [vmem:[%s1521_s7 + $0xf8] sm:$0xff] %vm742_vm1, %v741_v32 }

</bundles_post_ra>
